<compile_context>
chip_gen: v7x
topology: tpu7x:2x2x1
jax: 0.10.0
libtpu: 0.0.40
codegen_flags: <defaults>
</compile_context>

<pallas_src>
import functools
import math

import jax
import jax.numpy as jnp
from jax import lax
from jax.experimental import pallas as pl
from jax.experimental.pallas import tpu as pltpu


def _pick_heads_per_block(num_heads, d_head):
    """Smallest head-group G (dividing H) whose output width is lane-dense."""
    for g in range(1, num_heads + 1):
        if num_heads % g == 0 and (g * d_head) % 128 == 0:
            return g
    return num_heads  # can't reach 128 lanes; do all heads in one step


def _fuse_params(params, heads_per_block, residual):
    """Stack per-head Q/K/V(/self) weights+biases into per-group fused blocks."""
    H, d, F = params["wq"].shape
    G = heads_per_block
    ng = H // G
    wparts = [params["wq"], params["wk"], params["wv"]]
    bparts = [params["bq"], params["bk"], params["bv"]]
    if residual:
        wparts.append(params["ws"])
        bparts.append(params["bs"])
    # (H, d, F) -> (ng, G*d, F): heads are head-major inside a group
    w_all = jnp.concatenate([w.reshape(ng, G * d, F) for w in wparts], axis=1)
    # (H, 1, d) -> (ng, 1, G*d), parts concatenated along lanes
    b_all = jnp.concatenate([b.reshape(ng, 1, G * d) for b in bparts], axis=-1)
    return w_all, b_all


def _group_kernel(feat_ref, mask_ref, w_ref, b_ref, out_ref, *,
                  heads_per_block, d_head, residual):
    """One grid step = one group of G heads (fused projection + attention)."""
    G, d = heads_per_block, d_head
    Gd = G * d

    feat = feat_ref[...]                      # (N, F_in)   bf16
    mask_add = mask_ref[...]                  # (N, N)      f32: 0 / -1e30
    w = w_ref[0]                              # (P*G*d, F_in) bf16
    b = b_ref[0]                              # (1, P*G*d)  f32

    # Fused Q|K|V|(self) projection for the whole group: one lane-dense MXU
    # pass, bf16 operands, f32 accumulation, single broadcast bias add.
    proj = lax.dot_general(
        feat, w,
        dimension_numbers=(((1,), (1,)), ((), ())),
        preferred_element_type=jnp.float32) + b            # (N, P*G*d) f32

    q_all = proj[:, 0 * Gd:1 * Gd]
    k_all = proj[:, 1 * Gd:2 * Gd]
    v_all = proj[:, 2 * Gd:3 * Gd]
    res_all = proj[:, 3 * Gd:4 * Gd] if residual else None

    neg_thresh = jnp.float32(-1e29)

    for h in range(G):                        # static unroll over group heads
        sl = slice(h * d, (h + 1) * d)
        q_h = q_all[:, sl].astype(jnp.bfloat16)            # (N, d)
        k_h = k_all[:, sl].astype(jnp.bfloat16)
        v_h = v_all[:, sl].astype(jnp.bfloat16)

        # scores[dst, src] = <q[dst], k[src]>  (contraction, no transpose)
        scores = lax.dot_general(
            q_h, k_h, dimension_numbers=(((1,), (1,)), ((), ())),
            preferred_element_type=jnp.float32)            # (N_dst, N_src)

        # edge softmax over in-edges of each dst (masked softmax over src),
        # kept in f32 (v5e has no bf16 VPU/EUP path).
        masked = scores + mask_add
        m = jnp.max(masked, axis=-1, keepdims=True)        # (N, 1)
        p = jnp.exp(masked - m)                            # non-edges -> 0
        denom = jnp.sum(p, axis=-1, keepdims=True)         # >= 1
        # zero-in-degree rows (m ~ -1e30) get all-zero attention, matching
        # DGL's "sum of no messages" semantics.
        inv = jnp.where(m > neg_thresh,
                        pl.reciprocal(denom, approx=True),
                        jnp.float32(0.0))
        attn = (p * inv).astype(jnp.bfloat16)

        # message passing: h[dst] = sum_src attn[dst, src] * v[src]
        msg = lax.dot_general(
            attn, v_h, dimension_numbers=(((1,), (0,)), ((), ())),
            preferred_element_type=jnp.float32)            # (N, d)
        if residual:
            msg = msg + res_all[:, sl]

        # write head h of this group into its lane slice of the output slab
        out_ref[:, sl] = msg.astype(out_ref.dtype)


def transformer_forward(feat, adj, params, *, residual=True):
    """Pallas-backed forward of the graph Transformer layer."""
    N, F_in = feat.shape
    H, d_head, _ = params["wq"].shape

    G = _pick_heads_per_block(H, d_head)
    num_groups = H // G
    P = 4 if residual else 3
    PGd = P * G * d_head

    w_all, b_all = _fuse_params(params, G, residual)
    # bf16 matmul operands (halves feat/weight DMA bytes); bias stays f32.
    feat_bf = feat.astype(jnp.bfloat16)
    w_all = w_all.astype(jnp.bfloat16)
    # additive mask: 0 where edge, -1e30 where not (dst rows, src cols)
    mask_add = jnp.where(adj > 0.0, 0.0, -1e30).astype(jnp.float32)

    kernel = functools.partial(_group_kernel, heads_per_block=G,
                               d_head=d_head, residual=residual)

    # rough per-step VMEM footprint (double-buffered blocks + temporaries);
    # floor at the 32 MiB default, cap at 64 MiB so it is valid on v7x too.
    est = (2 * (4 * N * N + 2 * N * F_in + 2 * PGd * F_in + 4 * PGd)
           + 2 * 4 * N * G * d_head
           + 4 * (N * PGd + 3 * N * N))
    vmem_limit = int(min(max(2 * est, 32 * 1024 * 1024), 64 * 1024 * 1024))

    out = pl.pallas_call(
        kernel,
        out_shape=jax.ShapeDtypeStruct((N, H * d_head), jnp.float32),
        grid_spec=pltpu.PrefetchScalarGridSpec(
            num_scalar_prefetch=0,
            grid=(num_groups,),
            in_specs=[
                pl.BlockSpec((N, F_in), lambda g: (0, 0)),       # feat (bf16)
                pl.BlockSpec((N, N), lambda g: (0, 0)),          # additive mask
                pl.BlockSpec((1, PGd, F_in), lambda g: (g, 0, 0)),  # fused W
                pl.BlockSpec((1, 1, PGd), lambda g: (g, 0, 0)),     # fused b
            ],
            out_specs=pl.BlockSpec((N, G * d_head), lambda g: (0, g)),
        ),
        compiler_params=pltpu.CompilerParams(
            dimension_semantics=("parallel",),
            vmem_limit_bytes=vmem_limit,
        ),
    )(feat_bf, mask_add, w_all, b_all)

    # already in (N, H*d_head) == torch.cat(rst_list, dim=-1) layout
    return out


def init_params(key, in_feats, out_feats, num_heads):
    """Deterministic parameter init mirroring the PyTorch module's shapes."""
    d_head = out_feats // num_heads

    def xavier(k, shape):
        fan_out, fan_in = shape[-2], shape[-1]
        bound = math.sqrt(6.0 / (fan_in + fan_out))
        return jax.random.uniform(k, shape, jnp.float32, -bound, bound)

    def bias(k, shape, fan_in):
        bound = 1.0 / math.sqrt(fan_in)
        return jax.random.uniform(k, shape, jnp.float32, -bound, bound)

    keys = jax.random.split(key, 8)
    params = {
        "wq": xavier(keys[0], (num_heads, d_head, in_feats)),
        "bq": bias(keys[1], (num_heads, 1, d_head), in_feats),
        "wk": xavier(keys[2], (num_heads, d_head, in_feats)),
        "bk": bias(keys[3], (num_heads, 1, d_head), in_feats),
        "wv": xavier(keys[4], (num_heads, d_head, in_feats)),
        "bv": bias(keys[5], (num_heads, 1, d_head), in_feats),
        # W_self: (out_feats, in_feats) viewed as (H, d_head, in_feats)
        "ws": xavier(keys[6], (out_feats, in_feats)).reshape(num_heads, d_head, in_feats),
        "bs": bias(keys[7], (out_feats,), in_feats).reshape(num_heads, 1, d_head),
    }
    return params


def reference_forward(feat, adj, params, residual):
    """Pure-JAX reference with the same matmul precision policy as the kernel
    (bf16 MXU operands, f32 accumulation, f32 softmax, exact division)."""
    H, d_head, _ = params["wq"].shape
    mask = adj > 0.0
    feat_bf = feat.astype(jnp.bfloat16)

    def proj(w, b):
        return lax.dot_general(
            feat_bf, w.astype(jnp.bfloat16),
            dimension_numbers=(((1,), (1,)), ((), ())),
            preferred_element_type=jnp.float32) + b

    outs = []
    for h in range(H):
        q = proj(params["wq"][h], params["bq"][h])
        k = proj(params["wk"][h], params["bk"][h])
        v = proj(params["wv"][h], params["bv"][h])
        scores = lax.dot_general(
            q.astype(jnp.bfloat16), k.astype(jnp.bfloat16),
            dimension_numbers=(((1,), (1,)), ((), ())),
            preferred_element_type=jnp.float32)
        masked = jnp.where(mask, scores, -1e30)
        m = jnp.max(masked, axis=-1, keepdims=True)
        p = jnp.where(mask, jnp.exp(masked - m), 0.0)
        denom = jnp.sum(p, axis=-1, keepdims=True)
        attn = p / jnp.where(denom == 0.0, 1.0, denom)
        hout = jnp.dot(attn.astype(jnp.bfloat16), v.astype(jnp.bfloat16),
                       preferred_element_type=jnp.float32)
        if residual:
            hout = hout + proj(params["ws"][h], params["bs"][h])
        outs.append(hout)
    return jnp.concatenate(outs, axis=-1)


if __name__ == "__main__":
    # Small shapes consistent with the module: N nodes, in_feats -> out_feats, H heads.
    N = 16
    in_feats = 32
    out_feats = 32
    num_heads = 4
    residual = True

    key = jax.random.PRNGKey(0)
    k_feat, k_adj, k_params = jax.random.split(key, 3)

    feat = jax.random.normal(k_feat, (N, in_feats), jnp.float32)
    # Dense adjacency mask adj[dst, src]; self-loops so most dsts have in-edges.
    adj = jax.random.bernoulli(k_adj, 0.4, (N, N)).astype(jnp.float32)
    adj = jnp.clip(adj + jnp.eye(N, dtype=jnp.float32), 0.0, 1.0)
    # exercise the zero-in-degree path: node 3 receives no messages
    adj = adj.at[3, :].set(0.0)

    params = init_params(k_params, in_feats, out_feats, num_heads)

    out = transformer_forward(feat, adj, params, residual=residual)
    out = jax.block_until_ready(out)

    ref = reference_forward(feat, adj, params, residual)
    assert out.shape == (N, out_feats)
    # tolerance covers approx-reciprocal and accumulation-order differences
    assert jnp.allclose(out, ref, rtol=2e-2, atol=2e-2), "mismatch vs reference"

    print("KERNEL_OK")
</pallas_src>

<mosaic_0001>
module attributes {stable_mosaic.version = 11 : i64} {
  func.func @_group_kernel(%arg0: i32, %arg1: memref<16x32xbf16, #tpu.memory_space<vmem>>, %arg2: memref<16x16xf32, #tpu.memory_space<vmem>>, %arg3: memref<1x128x32xbf16, #tpu.memory_space<vmem>>, %arg4: memref<1x1x128xf32, #tpu.memory_space<vmem>>, %arg5: memref<16x32xf32, #tpu.memory_space<vmem>>) attributes {dimension_semantics = [#tpu.dimension_semantics<parallel>], iteration_bounds = array<i64: 1>, scalar_prefetch = 0 : i64, scratch_operands = 0 : i64, tpu.core_type = #tpu.core_type<tc>, window_params = [{pipeline_mode = #tpu.pipeline_mode<synchronous>, transform_indices = @transform_0, window_bounds = array<i64: 16, 32>}, {pipeline_mode = #tpu.pipeline_mode<synchronous>, transform_indices = @transform_1, window_bounds = array<i64: 16, 16>}, {transform_indices = @transform_2, window_bounds = array<i64: 1, 128, 32>}, {transform_indices = @transform_3, window_bounds = array<i64: 1, 1, 128>}, {transform_indices = @transform_4, window_bounds = array<i64: 16, 32>}]} {
    %c0 = arith.constant 0 : index
    %c0_0 = arith.constant 0 : index
    %0 = vector.load %arg1[%c0, %c0_0] : memref<16x32xbf16, #tpu.memory_space<vmem>>, vector<16x32xbf16>
    %c0_1 = arith.constant 0 : index
    %c0_2 = arith.constant 0 : index
    %1 = vector.load %arg2[%c0_1, %c0_2] : memref<16x16xf32, #tpu.memory_space<vmem>>, vector<16x16xf32>
    %c0_3 = arith.constant 0 : index
    %c0_4 = arith.constant 0 : index
    %c0_5 = arith.constant 0 : index
    %2 = vector.load %arg3[%c0_3, %c0_4, %c0_5] : memref<1x128x32xbf16, #tpu.memory_space<vmem>>, vector<1x128x32xbf16>
    %3 = vector.shape_cast %2 : vector<1x128x32xbf16> to vector<128x32xbf16>
    %c0_6 = arith.constant 0 : index
    %c0_7 = arith.constant 0 : index
    %c0_8 = arith.constant 0 : index
    %4 = vector.load %arg4[%c0_6, %c0_7, %c0_8] : memref<1x1x128xf32, #tpu.memory_space<vmem>>, vector<1x1x128xf32>
    %5 = vector.shape_cast %4 : vector<1x1x128xf32> to vector<1x128xf32>
    %cst = arith.constant dense<0.000000e+00> : vector<16x128xf32>
    %6 = tpu.matmul %0, %3, %cst {dimension_numbers = #tpu.dot_dimension_numbers<[1], [1], [0], [0], [0, 0, 1, 0], [], []>} : vector<16x32xbf16>, vector<128x32xbf16>, vector<16x128xf32> -> vector<16x128xf32>
    %7 = vector.broadcast %5 : vector<1x128xf32> to vector<16x128xf32>
    %8 = arith.addf %6, %7 : vector<16x128xf32>
    %9 = vector.extract_strided_slice %8 {offsets = [0, 0], sizes = [16, 32], strides = [1, 1]} : vector<16x128xf32> to vector<16x32xf32>
    %10 = vector.extract_strided_slice %8 {offsets = [0, 32], sizes = [16, 32], strides = [1, 1]} : vector<16x128xf32> to vector<16x32xf32>
    %11 = vector.extract_strided_slice %8 {offsets = [0, 64], sizes = [16, 32], strides = [1, 1]} : vector<16x128xf32> to vector<16x32xf32>
    %12 = vector.extract_strided_slice %8 {offsets = [0, 96], sizes = [16, 32], strides = [1, 1]} : vector<16x128xf32> to vector<16x32xf32>
    %13 = vector.extract_strided_slice %9 {offsets = [0, 0], sizes = [16, 8], strides = [1, 1]} : vector<16x32xf32> to vector<16x8xf32>
    %14 = arith.truncf %13 : vector<16x8xf32> to vector<16x8xbf16>
    %15 = vector.extract_strided_slice %10 {offsets = [0, 0], sizes = [16, 8], strides = [1, 1]} : vector<16x32xf32> to vector<16x8xf32>
    %16 = arith.truncf %15 : vector<16x8xf32> to vector<16x8xbf16>
    %17 = vector.extract_strided_slice %11 {offsets = [0, 0], sizes = [16, 8], strides = [1, 1]} : vector<16x32xf32> to vector<16x8xf32>
    %18 = arith.truncf %17 : vector<16x8xf32> to vector<16x8xbf16>
    %cst_9 = arith.constant dense<0.000000e+00> : vector<16x16xf32>
    %19 = tpu.matmul %14, %16, %cst_9 {dimension_numbers = #tpu.dot_dimension_numbers<[1], [1], [0], [0], [0, 0, 1, 0], [], []>} : vector<16x8xbf16>, vector<16x8xbf16>, vector<16x16xf32> -> vector<16x16xf32>
    %20 = arith.addf %19, %1 : vector<16x16xf32>
    %cst_10 = arith.constant dense<0xFF800000> : vector<16xf32>
    %21 = vector.multi_reduction <maximumf>, %20, %cst_10 [1] : vector<16x16xf32> to vector<16xf32>
    %22 = vector.shape_cast %21 : vector<16xf32> to vector<16x1xf32>
    %23 = vector.broadcast %22 : vector<16x1xf32> to vector<16x16xf32>
    %24 = arith.subf %20, %23 : vector<16x16xf32>
    %25 = math.exp %24 : vector<16x16xf32>
    %cst_11 = arith.constant dense<0.000000e+00> : vector<16xf32>
    %26 = vector.multi_reduction <add>, %25, %cst_11 [1] : vector<16x16xf32> to vector<16xf32>
    %27 = vector.shape_cast %26 : vector<16xf32> to vector<16x1xf32>
    %cst_12 = arith.constant -1.000000e+29 : f32
    %28 = vector.broadcast %cst_12 : f32 to vector<16x1xf32>
    %29 = arith.cmpf ogt, %22, %28 : vector<16x1xf32>
    %30 = tpu.reciprocal %27 {approx = true} : vector<16x1xf32> -> vector<16x1xf32>
    %cst_13 = arith.constant 0.000000e+00 : f32
    %31 = vector.broadcast %cst_13 : f32 to vector<16x1xf32>
    %32 = arith.select %29, %30, %31 : vector<16x1xi1>, vector<16x1xf32>
    %33 = vector.broadcast %32 : vector<16x1xf32> to vector<16x16xf32>
    %34 = arith.mulf %25, %33 : vector<16x16xf32>
    %35 = arith.truncf %34 : vector<16x16xf32> to vector<16x16xbf16>
    %cst_14 = arith.constant dense<0.000000e+00> : vector<16x8xf32>
    %36 = tpu.matmul %35, %18, %cst_14 {dimension_numbers = #tpu.dot_dimension_numbers<[1], [0], [0], [1], [0, 0, 1, 1], [], []>} : vector<16x16xbf16>, vector<16x8xbf16>, vector<16x8xf32> -> vector<16x8xf32>
    %37 = vector.extract_strided_slice %12 {offsets = [0, 0], sizes = [16, 8], strides = [1, 1]} : vector<16x32xf32> to vector<16x8xf32>
    %38 = arith.addf %36, %37 : vector<16x8xf32>
    %c0_15 = arith.constant 0 : index
    %c0_16 = arith.constant 0 : index
    %39 = vector.load %arg5[%c0_15, %c0_16] : memref<16x32xf32, #tpu.memory_space<vmem>>, vector<16x8xf32>
    tpu.vector_store %arg5[%c0_15, %c0_16], %38 {strides = array<i32>} : memref<16x32xf32, #tpu.memory_space<vmem>>, vector<16x8xf32>,
    %40 = vector.extract_strided_slice %9 {offsets = [0, 8], sizes = [16, 8], strides = [1, 1]} : vector<16x32xf32> to vector<16x8xf32>
    %41 = arith.truncf %40 : vector<16x8xf32> to vector<16x8xbf16>
    %42 = vector.extract_strided_slice %10 {offsets = [0, 8], sizes = [16, 8], strides = [1, 1]} : vector<16x32xf32> to vector<16x8xf32>
    %43 = arith.truncf %42 : vector<16x8xf32> to vector<16x8xbf16>
    %44 = vector.extract_strided_slice %11 {offsets = [0, 8], sizes = [16, 8], strides = [1, 1]} : vector<16x32xf32> to vector<16x8xf32>
    %45 = arith.truncf %44 : vector<16x8xf32> to vector<16x8xbf16>
    %cst_17 = arith.constant dense<0.000000e+00> : vector<16x16xf32>
    %46 = tpu.matmul %41, %43, %cst_17 {dimension_numbers = #tpu.dot_dimension_numbers<[1], [1], [0], [0], [0, 0, 1, 0], [], []>} : vector<16x8xbf16>, vector<16x8xbf16>, vector<16x16xf32> -> vector<16x16xf32>
    %47 = arith.addf %46, %1 : vector<16x16xf32>
    %cst_18 = arith.constant dense<0xFF800000> : vector<16xf32>
    %48 = vector.multi_reduction <maximumf>, %47, %cst_18 [1] : vector<16x16xf32> to vector<16xf32>
    %49 = vector.shape_cast %48 : vector<16xf32> to vector<16x1xf32>
    %50 = vector.broadcast %49 : vector<16x1xf32> to vector<16x16xf32>
    %51 = arith.subf %47, %50 : vector<16x16xf32>
    %52 = math.exp %51 : vector<16x16xf32>
    %cst_19 = arith.constant dense<0.000000e+00> : vector<16xf32>
    %53 = vector.multi_reduction <add>, %52, %cst_19 [1] : vector<16x16xf32> to vector<16xf32>
    %54 = vector.shape_cast %53 : vector<16xf32> to vector<16x1xf32>
    %cst_20 = arith.constant -1.000000e+29 : f32
    %55 = vector.broadcast %cst_20 : f32 to vector<16x1xf32>
    %56 = arith.cmpf ogt, %49, %55 : vector<16x1xf32>
    %57 = tpu.reciprocal %54 {approx = true} : vector<16x1xf32> -> vector<16x1xf32>
    %cst_21 = arith.constant 0.000000e+00 : f32
    %58 = vector.broadcast %cst_21 : f32 to vector<16x1xf32>
    %59 = arith.select %56, %57, %58 : vector<16x1xi1>, vector<16x1xf32>
    %60 = vector.broadcast %59 : vector<16x1xf32> to vector<16x16xf32>
    %61 = arith.mulf %52, %60 : vector<16x16xf32>
    %62 = arith.truncf %61 : vector<16x16xf32> to vector<16x16xbf16>
    %cst_22 = arith.constant dense<0.000000e+00> : vector<16x8xf32>
    %63 = tpu.matmul %62, %45, %cst_22 {dimension_numbers = #tpu.dot_dimension_numbers<[1], [0], [0], [1], [0, 0, 1, 1], [], []>} : vector<16x16xbf16>, vector<16x8xbf16>, vector<16x8xf32> -> vector<16x8xf32>
    %64 = vector.extract_strided_slice %12 {offsets = [0, 8], sizes = [16, 8], strides = [1, 1]} : vector<16x32xf32> to vector<16x8xf32>
    %65 = arith.addf %63, %64 : vector<16x8xf32>
    %c0_23 = arith.constant 0 : index
    %c8 = arith.constant 8 : index
    %66 = vector.load %arg5[%c0_23, %c8] : memref<16x32xf32, #tpu.memory_space<vmem>>, vector<16x8xf32>
    tpu.vector_store %arg5[%c0_23, %c8], %65 {strides = array<i32>} : memref<16x32xf32, #tpu.memory_space<vmem>>, vector<16x8xf32>,
    %67 = vector.extract_strided_slice %9 {offsets = [0, 16], sizes = [16, 8], strides = [1, 1]} : vector<16x32xf32> to vector<16x8xf32>
    %68 = arith.truncf %67 : vector<16x8xf32> to vector<16x8xbf16>
    %69 = vector.extract_strided_slice %10 {offsets = [0, 16], sizes = [16, 8], strides = [1, 1]} : vector<16x32xf32> to vector<16x8xf32>
    %70 = arith.truncf %69 : vector<16x8xf32> to vector<16x8xbf16>
    %71 = vector.extract_strided_slice %11 {offsets = [0, 16], sizes = [16, 8], strides = [1, 1]} : vector<16x32xf32> to vector<16x8xf32>
    %72 = arith.truncf %71 : vector<16x8xf32> to vector<16x8xbf16>
    %cst_24 = arith.constant dense<0.000000e+00> : vector<16x16xf32>
    %73 = tpu.matmul %68, %70, %cst_24 {dimension_numbers = #tpu.dot_dimension_numbers<[1], [1], [0], [0], [0, 0, 1, 0], [], []>} : vector<16x8xbf16>, vector<16x8xbf16>, vector<16x16xf32> -> vector<16x16xf32>
    %74 = arith.addf %73, %1 : vector<16x16xf32>
    %cst_25 = arith.constant dense<0xFF800000> : vector<16xf32>
    %75 = vector.multi_reduction <maximumf>, %74, %cst_25 [1] : vector<16x16xf32> to vector<16xf32>
    %76 = vector.shape_cast %75 : vector<16xf32> to vector<16x1xf32>
    %77 = vector.broadcast %76 : vector<16x1xf32> to vector<16x16xf32>
    %78 = arith.subf %74, %77 : vector<16x16xf32>
    %79 = math.exp %78 : vector<16x16xf32>
    %cst_26 = arith.constant dense<0.000000e+00> : vector<16xf32>
    %80 = vector.multi_reduction <add>, %79, %cst_26 [1] : vector<16x16xf32> to vector<16xf32>
    %81 = vector.shape_cast %80 : vector<16xf32> to vector<16x1xf32>
    %cst_27 = arith.constant -1.000000e+29 : f32
    %82 = vector.broadcast %cst_27 : f32 to vector<16x1xf32>
    %83 = arith.cmpf ogt, %76, %82 : vector<16x1xf32>
    %84 = tpu.reciprocal %81 {approx = true} : vector<16x1xf32> -> vector<16x1xf32>
    %cst_28 = arith.constant 0.000000e+00 : f32
    %85 = vector.broadcast %cst_28 : f32 to vector<16x1xf32>
    %86 = arith.select %83, %84, %85 : vector<16x1xi1>, vector<16x1xf32>
    %87 = vector.broadcast %86 : vector<16x1xf32> to vector<16x16xf32>
    %88 = arith.mulf %79, %87 : vector<16x16xf32>
    %89 = arith.truncf %88 : vector<16x16xf32> to vector<16x16xbf16>
    %cst_29 = arith.constant dense<0.000000e+00> : vector<16x8xf32>
    %90 = tpu.matmul %89, %72, %cst_29 {dimension_numbers = #tpu.dot_dimension_numbers<[1], [0], [0], [1], [0, 0, 1, 1], [], []>} : vector<16x16xbf16>, vector<16x8xbf16>, vector<16x8xf32> -> vector<16x8xf32>
    %91 = vector.extract_strided_slice %12 {offsets = [0, 16], sizes = [16, 8], strides = [1, 1]} : vector<16x32xf32> to vector<16x8xf32>
    %92 = arith.addf %90, %91 : vector<16x8xf32>
    %c0_30 = arith.constant 0 : index
    %c16 = arith.constant 16 : index
    %93 = vector.load %arg5[%c0_30, %c16] : memref<16x32xf32, #tpu.memory_space<vmem>>, vector<16x8xf32>
    tpu.vector_store %arg5[%c0_30, %c16], %92 {strides = array<i32>} : memref<16x32xf32, #tpu.memory_space<vmem>>, vector<16x8xf32>,
    %94 = vector.extract_strided_slice %9 {offsets = [0, 24], sizes = [16, 8], strides = [1, 1]} : vector<16x32xf32> to vector<16x8xf32>
    %95 = arith.truncf %94 : vector<16x8xf32> to vector<16x8xbf16>
    %96 = vector.extract_strided_slice %10 {offsets = [0, 24], sizes = [16, 8], strides = [1, 1]} : vector<16x32xf32> to vector<16x8xf32>
    %97 = arith.truncf %96 : vector<16x8xf32> to vector<16x8xbf16>
    %98 = vector.extract_strided_slice %11 {offsets = [0, 24], sizes = [16, 8], strides = [1, 1]} : vector<16x32xf32> to vector<16x8xf32>
    %99 = arith.truncf %98 : vector<16x8xf32> to vector<16x8xbf16>
    %cst_31 = arith.constant dense<0.000000e+00> : vector<16x16xf32>
    %100 = tpu.matmul %95, %97, %cst_31 {dimension_numbers = #tpu.dot_dimension_numbers<[1], [1], [0], [0], [0, 0, 1, 0], [], []>} : vector<16x8xbf16>, vector<16x8xbf16>, vector<16x16xf32> -> vector<16x16xf32>
    %101 = arith.addf %100, %1 : vector<16x16xf32>
    %cst_32 = arith.constant dense<0xFF800000> : vector<16xf32>
    %102 = vector.multi_reduction <maximumf>, %101, %cst_32 [1] : vector<16x16xf32> to vector<16xf32>
    %103 = vector.shape_cast %102 : vector<16xf32> to vector<16x1xf32>
    %104 = vector.broadcast %103 : vector<16x1xf32> to vector<16x16xf32>
    %105 = arith.subf %101, %104 : vector<16x16xf32>
    %106 = math.exp %105 : vector<16x16xf32>
    %cst_33 = arith.constant dense<0.000000e+00> : vector<16xf32>
    %107 = vector.multi_reduction <add>, %106, %cst_33 [1] : vector<16x16xf32> to vector<16xf32>
    %108 = vector.shape_cast %107 : vector<16xf32> to vector<16x1xf32>
    %cst_34 = arith.constant -1.000000e+29 : f32
    %109 = vector.broadcast %cst_34 : f32 to vector<16x1xf32>
    %110 = arith.cmpf ogt, %103, %109 : vector<16x1xf32>
    %111 = tpu.reciprocal %108 {approx = true} : vector<16x1xf32> -> vector<16x1xf32>
    %cst_35 = arith.constant 0.000000e+00 : f32
    %112 = vector.broadcast %cst_35 : f32 to vector<16x1xf32>
    %113 = arith.select %110, %111, %112 : vector<16x1xi1>, vector<16x1xf32>
    %114 = vector.broadcast %113 : vector<16x1xf32> to vector<16x16xf32>
    %115 = arith.mulf %106, %114 : vector<16x16xf32>
    %116 = arith.truncf %115 : vector<16x16xf32> to vector<16x16xbf16>
    %cst_36 = arith.constant dense<0.000000e+00> : vector<16x8xf32>
    %117 = tpu.matmul %116, %99, %cst_36 {dimension_numbers = #tpu.dot_dimension_numbers<[1], [0], [0], [1], [0, 0, 1, 1], [], []>} : vector<16x16xbf16>, vector<16x8xbf16>, vector<16x8xf32> -> vector<16x8xf32>
    %118 = vector.extract_strided_slice %12 {offsets = [0, 24], sizes = [16, 8], strides = [1, 1]} : vector<16x32xf32> to vector<16x8xf32>
    %119 = arith.addf %117, %118 : vector<16x8xf32>
    %c0_37 = arith.constant 0 : index
    %c24 = arith.constant 24 : index
    %120 = vector.load %arg5[%c0_37, %c24] : memref<16x32xf32, #tpu.memory_space<vmem>>, vector<16x8xf32>
    tpu.vector_store %arg5[%c0_37, %c24], %119 {strides = array<i32>} : memref<16x32xf32, #tpu.memory_space<vmem>>, vector<16x8xf32>,
    return
  }
  func.func @transform_0(%arg0: i32) -> (i32, i32) {
    %c0_i32 = arith.constant 0 : i32
    %c0_i32_0 = arith.constant 0 : i32
    %c0_i32_1 = arith.constant 0 : i32
    return %c0_i32, %c0_i32_0 : i32, i32
  }
  func.func @transform_1(%arg0: i32) -> (i32, i32) {
    %c0_i32 = arith.constant 0 : i32
    %c0_i32_0 = arith.constant 0 : i32
    %c0_i32_1 = arith.constant 0 : i32
    return %c0_i32, %c0_i32_0 : i32, i32
  }
  func.func @transform_2(%arg0: i32) -> (i32, i32, i32) {
    %c0_i32 = arith.constant 0 : i32
    %c0_i32_0 = arith.constant 0 : i32
    %c0_i32_1 = arith.constant 0 : i32
    return %arg0, %c0_i32, %c0_i32_0 : i32, i32, i32
  }
  func.func @transform_3(%arg0: i32) -> (i32, i32, i32) {
    %c0_i32 = arith.constant 0 : i32
    %c0_i32_0 = arith.constant 0 : i32
    %c0_i32_1 = arith.constant 0 : i32
    return %arg0, %c0_i32, %c0_i32_0 : i32, i32, i32
  }
  func.func @transform_4(%arg0: i32) -> (i32, i32) {
    %c0_i32 = arith.constant 0 : i32
    %c0_i32_0 = arith.constant 0 : i32
    return %c0_i32, %arg0 : i32, i32
  }
}

</mosaic_0001>

<bundles_post_ra>
// kernel: tpu_custom_call.1
= control target key start
LH: loop header
LB: loop body
LE: loop exit
PB: predicated region body
PF: predicated region fallthrough
CT: control target
= control target key end

     0   :  { %v935_v1 = vmov 0.0   ;;  %vm91_vm0 = vcmask 261120   ;;  %vm936_vm1 = vmmov 0   ;;  %s1170_s0 = inlined_call_operand.vmem [shape: bf16[16,32], index: 0, kind: input, shape index: {}]   ;;  %s1171_s1 = inlined_call_operand.vmem [shape: f32[16,16], index: 1, kind: input, shape index: {}]   ;;  %s1172_s2 = inlined_call_operand.vmem [shape: bf16[1,128,32], index: 2, kind: input, shape index: {}]   ;;  %s1173_s3 = inlined_call_operand.vmem [shape: f32[1,1,128], index: 3, kind: input, shape index: {}]   ;;  %s1174_s4 = inlined_call_operand.hbm [shape: f32[16,32], index: 4, kind: output, shape index: {}]  }
   0x1   :  { %v870_v0 = vld [vmem:[%s1172_s2] sm:$0xff]   ;;  %783 = vmatprep.subr.bf16.mxu0 %v935_v1  ;;  %803 = vmatprep.subr.bf16.mxu1 %v935_v1  ;;  %v871_v3 = vld [vmem:[%s1172_s2 + $0x8] sm:$0xff]  }
   0x2   :  { %v96_v2 = vsel %vm91_vm0, %v870_v0, 0  ;;  %v99_v4 = vsel %vm91_vm0, %v871_v3, 0  ;;  %799 = vmatprep.mubr.msk.bf16.mxu0 %vm936_vm1, %v935_v1  ;;  %805 = vmatprep.mubr.msk.bf16.mxu1 %vm936_vm1, %v935_v1 }
   0x3   :  { %784 = vmatpush3.bf16.xpose.msra.mxu0 %v96_v2 }
   0x4   :  { %785 = vmatprep.subr.bf16.mxu0 %v935_v1 }
   0x5   :  { %9 = vsyncpa [#allocation3], 0  ;;  %v872_v5 = vld [vmem:[%s1172_s2 + $0x10] sm:$0xff]   ;;  %v873_v7 = vld [vmem:[%s1172_s2 + $0x18] sm:$0xff]   ;;  %vm164_vm2 = vcmask 64512   ;;  %vm212_vm3 = vcmask 130048  }
   0x6   :  { %v102_v6 = vsel %vm91_vm0, %v872_v5, 0  ;;  %v105_v8 = vsel %vm91_vm0, %v873_v7, 0  ;;  %v874_v9 = vld [vmem:[%s1172_s2 + $0x20] sm:$0xff]   ;;  %v875_v11 = vld [vmem:[%s1172_s2 + $0x28] sm:$0xff]   ;;  %v876_v13 = vld [vmem:[%s1172_s2 + $0x30] sm:$0xff]   ;;  %s938_s11 = smov 64  }
   0x7   :  { %v108_v10 = vsel %vm91_vm0, %v874_v9, 0  ;;  %v111_v12 = vsel %vm91_vm0, %v875_v11, 0  ;;  %v114_v14 = vsel %vm91_vm0, %v876_v13, 0  ;;  %v877_v15 = vld [vmem:[%s1172_s2 + $0x38] sm:$0xff]   ;;  %v878_v17 = vld [vmem:[%s1170_s0] sm:$0xff]   ;;  %s937_s2 = smov 96  }
   0x8   :  { %v117_v16 = vsel %vm91_vm0, %v877_v15, 0  ;;  %v739_v18 = vld [vmem:[%s1173_s3] ss:$0 sm:$0xff]  ;;  %v1054_v30 = vld [vmem:[%s1171_s1 + $0x8] sm:$0xff]  ;;  %s940_s12 = smov 120   ;;  %s941_s13 = smov 56  }
   0x9   :  { %v1049_v28 = vld [vmem:[%s1171_s1] sm:$0xff]  ;;  %s939_s1 = smov 88   ;;  %s942_s14 = smov 80   ;;  %vm436_vm12 = vcmask 130112   ;;  %vm578_vm13 = vcmask 195712   ;;  %vm720_vm14 = vcmask 261312  }
   0xa   :  { %s943_s15 = smov 112   ;;  %s944_s16 = smov 48  }
   0xb   :  { %786 = vmatpush3.bf16.xpose.msra.mxu0 %v99_v4  ;;  %s945_s17 = smov 72   ;;  %s946_s18 = smov 104  }
   0xc   :  { %787 = vmatprep.subr.bf16.mxu0 %v935_v1  ;;  %s947_s19 = smov 16   ;;  %s948_s20 = smov 32  }
   0xd   :  { %s949_s21 = smov 40   ;;  %s950_s22 = smov 24  }
   0xe   :  { %s951_s23 = smov 8   ;;  %s952_s24 = smov [#allocation2]  }
   0xf   :  { %s728_s25 = sshll.u32 %s952_s24, 4  ;;  %s729_s25 = int_to_ptr.vmem [resolvable:$true] %s728_s25 }
  0x10   :  { %s911_s26 = scalar_lea.vmem %s729_s25, 256  ;;  %p916_p1 = scmp.lt.s32.totalorder %s729_s25, %s729_s25 }
  0x11   :  { %p912_p0 = scmp.ne.s32.totalorder %s729_s25, %s911_s26  ;;  %p917_p2 = scmp.lt.s32.totalorder %s911_s26, %s911_s26 }
  0x13   :  { %788 = vmatpush3.bf16.xpose.msra.mxu0 %v102_v6  ;;  %p918_p3 = por %p917_p2, %p916_p1 }
  0x14   :  { %789 = vmatprep.subr.bf16.mxu0 %v935_v1 }
  0x15   :  { %p919_p4 = pnand %p918_p3, %p912_p0 }
  0x1b   :  { %790 = vmatpush3.bf16.xpose.msra.mxu0 %v105_v8 }
  0x1c   :  { %791 = vmatprep.subr.bf16.mxu0 %v935_v1 }
  0x23   :  { %792 = vmatpush3.bf16.xpose.msra.mxu0 %v108_v10 }
  0x24   :  { %793 = vmatprep.subr.bf16.mxu0 %v935_v1 }
  0x2b   :  { %794 = vmatpush3.bf16.xpose.msra.mxu0 %v111_v12 }
  0x2c   :  { %795 = vmatprep.subr.bf16.mxu0 %v935_v1 }
  0x33   :  { %796 = vmatpush3.bf16.xpose.msra.mxu0 %v114_v14 }
  0x34   :  { %797 = vmatprep.subr.bf16.mxu0 %v935_v1 }
  0x3b   :  { %798 = vmatpush3.bf16.xpose.msra.mxu0 %v117_v16 }
  0x42   :  { %800 = vmatmul.mubr.msk.bf16.vlgmr.msra.gmra.mrb[0].mxu0 %vm91_vm0, %v878_v17 }
 0x115   :  { %v153_v19 = vpop.f32.mrb[0].mxu0 }
 0x116   :  { %v801_v20 = vpop.f32.mrb[1].mxu0  ;;  %v1031_v22 = vadd.f32 %v739_v18, %v153_v19 }
 0x117   :  { %v156_v21 = vpop.f32.mrb[2].mxu0 }
 0x118   :  { %v1033_v23 = vadd.f32 %v739_v18, %v156_v21  ;;  %v802_v24 = vpop.f32.mrb[3].mxu0 }
 0x11a   :  { %v1037_v25 = vpack.c.bf16 %v1033_v23, %v1031_v22 }
 0x11c   :  { %162 = vrot.lane.b32.xlu0 %v1037_v25, %s937_s2 }
 0x18e   :  { %v163_v26 = vpop.permute.xlu0 %162 }
 0x18f   :  { %v169_v27 = vsel %vm164_vm2, %v163_v26, 0 }
 0x190   :  { %804 = vmatpush3.bf16.xpose.msra.mxu1 %v169_v27 }
 0x191   :  { %809 = vmatprep.subr.bf16.mxu1 %v935_v1 }
 0x197   :  { %806 = vmatmul.mubr.msk.bf16.vlgmr.msra.gmra.mrb[0].mxu1 %vm164_vm2, %v1037_v25 }
 0x198   :  { %811 = vmatprep.mubr.msk.bf16.mxu1 %vm936_vm1, %v935_v1 }
 0x26a   :  { %v205_v29 = vpop.f32.mrb[0].mxu1 }
 0x26b   :  { %v206_v31 = vadd.f32 %v205_v29, %v1049_v28  ;;  %v807_v32 = vpop.f32.mrb[1].mxu1 }
 0x26c   :  { %v208_v33 = vpop.f32.mrb[2].mxu1 }
 0x26d   :  { %v209_v34 = vadd.f32 %v208_v33, %v1054_v30  ;;  %v808_v35 = vpop.f32.mrb[3].mxu1  ;;  %v213_v36 = vsel %vm212_vm3, %v206_v31, -inf }
 0x26e   :  { %214 = vmax.xlane.f32.xlu0 %v213_v36 }
 0x26f   :  { %v216_v37 = vsel %vm212_vm3, %v209_v34, -inf }
 0x270   :  { %217 = vmax.xlane.f32.xlu1 %v216_v37 }
 0x281   :  { %240 = vrot.lane.b32.xlu1 %v1037_v25, %s938_s11 }
 0x2fb   :  { %v215_v38 = vpop.xlane.xlu0 %214 }
 0x2fc   :  { %v219_v39 = vsub.f32 %v206_v31, %v215_v38  ;;  %vm231_vm4 = vcmp.gt.f32.partialorder %v215_v38, -1e+29 }
 0x2fd   :  { %v218_v40 = vpop.xlane.xlu1 %217 }
 0x2fe   :  { %v221_v41 = vmul.f32 1.442695, %v219_v39  ;;  %v220_v42 = vsub.f32 %v209_v34, %v218_v40  ;;  %vm232_vm5 = vcmp.gt.f32.partialorder %v218_v40, -1e+29 }
 0x300   :  { %879 = vpow2.f32 %v221_v41  ;;  %v223_v43 = vmul.f32 1.442695, %v220_v42 }
 0x301   :  { %v241_v44 = vpop.permute.xlu1 %240 }
 0x302   :  { %881 = vpow2.f32 %v223_v43  ;;  %810 = vmatpush3.bf16.msra.mxu1 %v241_v44 }
 0x303   :  { %815 = vmatprep.subr.bf16.mxu1 %v935_v1 }
 0x30a   :  { %v880_v45 = vpop.eup %879 }
 0x30b   :  { %v225_v46 = vsel %vm212_vm3, %v880_v45, 0.0 }
 0x30c   :  { %v882_v47 = vpop.eup %881  ;;  %226 = vadd.xlane.f32.xlu1 %v225_v46 }
 0x30d   :  { %v228_v48 = vsel %vm212_vm3, %v882_v47, 0.0 }
 0x310   :  { %229 = vadd.xlane.f32.xlu1 %v228_v48 }
 0x321   :  { %299 = vrot.lane.b32.xlu1 %v1037_v25, %s939_s1 }
 0x325   :  { %297 = vrot.lane.b32.xlu1 %v1037_v25, %s940_s12 }
 0x399   :  { %v227_v49 = vpop.xlane.xlu1 %226 }
 0x39a   :  { %883 = vrcp.f32 %v227_v49 }
 0x39d   :  { %v230_v50 = vpop.xlane.xlu1 %229 }
 0x39e   :  { %885 = vrcp.f32 %v230_v50 }
 0x3a1   :  { %v300_v57 = vpop.permute.xlu1 %299 }
 0x3a2   :  { %v305_v59 = vsel %vm164_vm2, %v300_v57, 0 }
 0x3a4   :  { %v884_v51 = vpop.eup %883 }
 0x3a5   :  { %v235_v52 = vsel %vm231_vm4, %v884_v51, 0.0  ;;  %v298_v60 = vpop.permute.xlu1 %297 }
 0x3a6   :  { %v237_v55 = vmul.f32 %v880_v45, %v235_v52 }
 0x3a8   :  { %v886_v53 = vpop.eup %885 }
 0x3a9   :  { %v236_v54 = vsel %vm232_vm5, %v886_v53, 0.0 }
 0x3aa   :  { %v238_v56 = vmul.f32 %v882_v47, %v236_v54 }
 0x3ac   :  { %v239_v58 = vpack.c.bf16 %v238_v56, %v237_v55 }
 0x3ae   :  { %812 = vmatmul.mubr.msk.bf16.vlgmr.msra.gmra.mrb[4].mxu1 %vm212_vm3, %v239_v58 }
 0x3af   :  { %816 = vmatpush3.bf16.xpose.msra.mxu1 %v305_v59  ;;  %817 = vmatprep.mubr.msk.bf16.mxu1 %vm936_vm1, %v935_v1 }
 0x3b0   :  { %821 = vmatprep.subr.bf16.mxu1 %v935_v1 }
 0x3b6   :  { %818 = vmatmul.mubr.msk.bf16.vlgmr.msra.gmra.mrb[8].mxu1 %vm164_vm2, %v298_v60 }
 0x3b7   :  { %823 = vmatprep.mubr.msk.bf16.mxu1 %vm936_vm1, %v935_v1 }
 0x481   :  { %v1074_v61 = vpop.f32.mrb[4].mxu1 }
 0x482   :  { %v813_v62 = vpop.f32.mrb[5].mxu1 }
 0x483   :  { %v1076_v63 = vpop.f32.mrb[6].mxu1 }
 0x484   :  { %v814_v0 = vpop.f32.mrb[7].mxu1 }
 0x489   :  { %v341_v2 = vpop.f32.mrb[8].mxu1 }
 0x48a   :  { %v342_v3 = vadd.f32 %v341_v2, %v1049_v28  ;;  %v819_v4 = vpop.f32.mrb[9].mxu1 }
 0x48b   :  { %v344_v5 = vpop.f32.mrb[10].mxu1 }
 0x48c   :  { %v345_v6 = vadd.f32 %v344_v5, %v1054_v30  ;;  %v820_v7 = vpop.f32.mrb[11].mxu1  ;;  %v348_v8 = vsel %vm212_vm3, %v342_v3, -inf }
 0x48d   :  { %349 = vmax.xlane.f32.xlu0 %v348_v8 }
 0x48e   :  { %v351_v9 = vsel %vm212_vm3, %v345_v6, -inf }
 0x48f   :  { %352 = vmax.xlane.f32.xlu1 %v351_v9 }
 0x4a3   :  { %375 = vrot.lane.b32.xlu0 %v1037_v25, %s941_s13 }
 0x51a   :  { %v350_v10 = vpop.xlane.xlu0 %349 }
 0x51b   :  { %v354_v11 = vsub.f32 %v342_v3, %v350_v10  ;;  %vm366_vm6 = vcmp.gt.f32.partialorder %v350_v10, -1e+29 }
 0x51c   :  { %v353_v12 = vpop.xlane.xlu1 %352 }
 0x51d   :  { %v356_v13 = vmul.f32 1.442695, %v354_v11  ;;  %v355_v14 = vsub.f32 %v345_v6, %v353_v12  ;;  %vm367_vm7 = vcmp.gt.f32.partialorder %v353_v12, -1e+29 }
 0x51e   :  { %v376_v15 = vpop.permute.xlu0 %375 }
 0x51f   :  { %887 = vpow2.f32 %v356_v13  ;;  %v358_v16 = vmul.f32 1.442695, %v355_v14  ;;  %822 = vmatpush3.bf16.msra.mxu1 %v376_v15 }
 0x520   :  { %827 = vmatprep.subr.bf16.mxu1 %v935_v1 }
 0x521   :  { %889 = vpow2.f32 %v358_v16 }
 0x529   :  { %v888_v17 = vpop.eup %887 }
 0x52a   :  { %v360_v18 = vsel %vm212_vm3, %v888_v17, 0.0 }
 0x52b   :  { %v890_v19 = vpop.eup %889  ;;  %361 = vadd.xlane.f32.xlu0 %v360_v18 }
 0x52c   :  { %v363_v20 = vsel %vm212_vm3, %v890_v19, 0.0 }
 0x52f   :  { %364 = vadd.xlane.f32.xlu0 %v363_v20 }
 0x545   :  { %441 = vrot.lane.b32.xlu0 %v1037_v25, %s942_s14 }
 0x549   :  { %439 = vrot.lane.b32.xlu0 %v1037_v25, %s943_s15 }
 0x5b8   :  { %v362_v21 = vpop.xlane.xlu0 %361 }
 0x5b9   :  { %891 = vrcp.f32 %v362_v21 }
 0x5bc   :  { %v365_v24 = vpop.xlane.xlu0 %364 }
 0x5bd   :  { %893 = vrcp.f32 %v365_v24 }
 0x5c0   :  { %v442_v34 = vpop.permute.xlu0 %441 }
 0x5c1   :  { %v447_v36 = vsel %vm164_vm2, %v442_v34, 0 }
 0x5c3   :  { %v892_v26 = vpop.eup %891 }
 0x5c4   :  { %v370_v27 = vsel %vm366_vm6, %v892_v26, 0.0  ;;  %v440_v37 = vpop.permute.xlu0 %439 }
 0x5c5   :  { %v372_v32 = vmul.f32 %v888_v17, %v370_v27 }
 0x5c7   :  { %v894_v29 = vpop.eup %893 }
 0x5c8   :  { %v371_v31 = vsel %vm367_vm7, %v894_v29, 0.0 }
 0x5c9   :  { %v373_v33 = vmul.f32 %v890_v19, %v371_v31 }
 0x5cb   :  { %v374_v35 = vpack.c.bf16 %v373_v33, %v372_v32 }
 0x5cd   :  { %824 = vmatmul.mubr.msk.bf16.vlgmr.msra.gmra.mrb[12].mxu1 %vm212_vm3, %v374_v35 }
 0x5ce   :  { %828 = vmatpush3.bf16.xpose.msra.mxu1 %v447_v36  ;;  %829 = vmatprep.mubr.msk.bf16.mxu1 %vm936_vm1, %v935_v1 }
 0x5cf   :  { %833 = vmatprep.subr.bf16.mxu1 %v935_v1 }
 0x5d5   :  { %830 = vmatmul.mubr.msk.bf16.vlgmr.msra.gmra.mrb[16].mxu1 %vm164_vm2, %v440_v37 }
 0x5d6   :  { %835 = vmatprep.mubr.msk.bf16.mxu1 %vm936_vm1, %v935_v1 }
 0x6a0   :  { %v1096_v38 = vpop.f32.mrb[12].mxu1 }
 0x6a1   :  { %v825_v39 = vpop.f32.mrb[13].mxu1 }
 0x6a2   :  { %v1098_v40 = vpop.f32.mrb[14].mxu1 }
 0x6a3   :  { %v826_v41 = vpop.f32.mrb[15].mxu1 }
 0x6a8   :  { %v483_v42 = vpop.f32.mrb[16].mxu1 }
 0x6a9   :  { %v484_v43 = vadd.f32 %v483_v42, %v1049_v28  ;;  %v831_v44 = vpop.f32.mrb[17].mxu1 }
 0x6aa   :  { %v486_v45 = vpop.f32.mrb[18].mxu1 }
 0x6ab   :  { %v487_v46 = vadd.f32 %v486_v45, %v1054_v30  ;;  %v832_v47 = vpop.f32.mrb[19].mxu1  ;;  %v490_v48 = vsel %vm212_vm3, %v484_v43, -inf }
 0x6ac   :  { %491 = vmax.xlane.f32.xlu1 %v490_v48 }
 0x6ad   :  { %v493_v49 = vsel %vm212_vm3, %v487_v46, -inf }
 0x6ae   :  { %494 = vmax.xlane.f32.xlu0 %v493_v49 }
 0x6bd   :  { %517 = vrot.lane.b32.xlu1 %v1037_v25, %s944_s16 }
 0x739   :  { %v492_v50 = vpop.xlane.xlu1 %491 }
 0x73a   :  { %v496_v51 = vsub.f32 %v484_v43, %v492_v50  ;;  %vm508_vm8 = vcmp.gt.f32.partialorder %v492_v50, -1e+29 }
 0x73b   :  { %v495_v52 = vpop.xlane.xlu0 %494 }
 0x73c   :  { %v498_v53 = vmul.f32 1.442695, %v496_v51  ;;  %v497_v54 = vsub.f32 %v487_v46, %v495_v52  ;;  %vm509_vm9 = vcmp.gt.f32.partialorder %v495_v52, -1e+29 }
 0x73d   :  { %v518_v55 = vpop.permute.xlu1 %517 }
 0x73e   :  { %895 = vpow2.f32 %v498_v53  ;;  %v500_v56 = vmul.f32 1.442695, %v497_v54  ;;  %834 = vmatpush3.bf16.msra.mxu1 %v518_v55 }
 0x73f   :  { %839 = vmatprep.subr.bf16.mxu1 %v935_v1 }
 0x740   :  { %897 = vpow2.f32 %v500_v56 }
 0x748   :  { %v896_v57 = vpop.eup %895 }
 0x749   :  { %v502_v58 = vsel %vm212_vm3, %v896_v57, 0.0 }
 0x74a   :  { %v898_v59 = vpop.eup %897  ;;  %503 = vadd.xlane.f32.xlu1 %v502_v58 }
 0x74b   :  { %v505_v60 = vsel %vm212_vm3, %v898_v59, 0.0 }
 0x74e   :  { %506 = vadd.xlane.f32.xlu1 %v505_v60 }
 0x75f   :  { %583 = vrot.lane.b32.xlu1 %v1037_v25, %s945_s17 }
 0x763   :  { %581 = vrot.lane.b32.xlu1 %v1037_v25, %s946_s18 }
 0x7d7   :  { %v504_v62 = vpop.xlane.xlu1 %503 }
 0x7d8   :  { %899 = vrcp.f32 %v504_v62 }
 0x7db   :  { %v507_v0 = vpop.xlane.xlu1 %506 }
 0x7dc   :  { %901 = vrcp.f32 %v507_v0 }
 0x7df   :  { %v584_v8 = vpop.permute.xlu1 %583 }
 0x7e0   :  { %v589_v10 = vsel %vm164_vm2, %v584_v8, 0 }
 0x7e2   :  { %v900_v2 = vpop.eup %899 }
 0x7e3   :  { %v512_v3 = vsel %vm508_vm8, %v900_v2, 0.0  ;;  %v582_v11 = vpop.permute.xlu1 %581 }
 0x7e4   :  { %v514_v6 = vmul.f32 %v896_v57, %v512_v3 }
 0x7e6   :  { %v902_v4 = vpop.eup %901 }
 0x7e7   :  { %v513_v5 = vsel %vm509_vm9, %v902_v4, 0.0 }
 0x7e8   :  { %v515_v7 = vmul.f32 %v898_v59, %v513_v5 }
 0x7ea   :  { %v516_v9 = vpack.c.bf16 %v515_v7, %v514_v6 }
 0x7ec   :  { %836 = vmatmul.mubr.msk.bf16.vlgmr.msra.gmra.mrb[20].mxu1 %vm212_vm3, %v516_v9 }
 0x7ed   :  { %840 = vmatpush3.bf16.xpose.msra.mxu1 %v589_v10  ;;  %841 = vmatprep.mubr.msk.bf16.mxu1 %vm936_vm1, %v935_v1 }
 0x7ee   :  { %845 = vmatprep.subr.bf16.mxu1 %v935_v1 }
 0x7f4   :  { %842 = vmatmul.mubr.msk.bf16.vlgmr.msra.gmra.mrb[24].mxu1 %vm164_vm2, %v582_v11 }
 0x7f5   :  { %847 = vmatprep.mubr.msk.bf16.mxu1 %vm936_vm1, %v935_v1 }
 0x8bf   :  { %v563_v12 = vpop.f32.mrb[20].mxu1 }
 0x8c0   :  { %v837_v13 = vpop.f32.mrb[21].mxu1 }
 0x8c1   :  { %v1118_v14 = vpop.f32.mrb[22].mxu1 }
 0x8c2   :  { %v838_v15 = vpop.f32.mrb[23].mxu1 }
 0x8c7   :  { %v625_v16 = vpop.f32.mrb[24].mxu1 }
 0x8c8   :  { %v626_v17 = vadd.f32 %v625_v16, %v1049_v28  ;;  %v843_v18 = vpop.f32.mrb[25].mxu1 }
 0x8c9   :  { %v628_v19 = vpop.f32.mrb[26].mxu1 }
 0x8ca   :  { %v629_v20 = vadd.f32 %v628_v19, %v1054_v30  ;;  %v844_v21 = vpop.f32.mrb[27].mxu1  ;;  %v632_v24 = vsel %vm212_vm3, %v626_v17, -inf }
 0x8cb   :  { %633 = vmax.xlane.f32.xlu0 %v632_v24 }
 0x8cc   :  { %v635_v26 = vsel %vm212_vm3, %v629_v20, -inf }
 0x8cd   :  { %636 = vmax.xlane.f32.xlu1 %v635_v26 }
 0x8de   :  { %520 = vrot.lane.b32.xlu1 %v1031_v22, %s947_s19 }
 0x8e2   :  { %247 = vrot.lane.b32.xlu1 %v1033_v23, %s948_s20 }
 0x958   :  { %v634_v1 = vpop.xlane.xlu0 %633 }
 0x959   :  { %v638_v28 = vsub.f32 %v626_v17, %v634_v1  ;;  %vm650_vm10 = vcmp.gt.f32.partialorder %v634_v1, -1e+29 }
 0x95a   :  { %v637_v27 = vpop.xlane.xlu1 %636 }
 0x95b   :  { %v640_v29 = vmul.f32 1.442695, %v638_v28  ;;  %v639_v30 = vsub.f32 %v629_v20, %v637_v27  ;;  %vm651_vm11 = vcmp.gt.f32.partialorder %v637_v27, -1e+29 }
 0x95d   :  { %903 = vpow2.f32 %v640_v29  ;;  %v642_v31 = vmul.f32 1.442695, %v639_v30 }
 0x95e   :  { %v521_v32 = vpop.permute.xlu1 %520 }
 0x95f   :  { %905 = vpow2.f32 %v642_v31  ;;  %v564_v33 = vadd.f32 %v563_v12, %v521_v32 }
 0x962   :  { %v248_v34 = vpop.permute.xlu1 %247 }
 0x963   :  { %v292_v35 = vadd.f32 %v1076_v63, %v248_v34 }
 0x965   :  { %296 = vst.msk [vmem:[#allocation2 + $0x8] sm:$0xff] %vm164_vm2, %v292_v35 }
 0x967   :  { %v904_v36 = vpop.eup %903 }
 0x968   :  { %v644_v37 = vsel %vm212_vm3, %v904_v36, 0.0 }
 0x969   :  { %v906_v39 = vpop.eup %905  ;;  %645 = vadd.xlane.f32.xlu0 %v644_v37 }
 0x96a   :  { %v647_v41 = vsel %vm212_vm3, %v906_v39, 0.0 }
 0x96d   :  { %648 = vadd.xlane.f32.xlu0 %v647_v41 }
 0x983   :  { %659 = vrot.lane.b32.xlu0 %v1037_v25, %s949_s21 }
 0x987   :  { %378 = vrot.lane.b32.xlu0 %v1031_v22, %s950_s22 }
 0x98b   :  { %380 = vrot.lane.b32.xlu0 %v1033_v23, %s950_s22 }
 0x98f   :  { %522 = vrot.lane.b32.xlu0 %v1033_v23, %s947_s19 }
 0x993   :  { %662 = vrot.lane.b32.xlu0 %v1031_v22, %s951_s23 }
 0x997   :  { %664 = vrot.lane.b32.xlu0 %v1033_v23, %s951_s23 }
 0x99b   :  { %245 = vrot.lane.b32.xlu0 %v1031_v22, %s948_s20 }
 0x9f6   :  { %v646_v25 = vpop.xlane.xlu0 %645 }
 0x9f7   :  { %907 = vrcp.f32 %v646_v25 }
 0x9fa   :  { %v649_v63 = vpop.xlane.xlu0 %648 }
 0x9fb   :  { %909 = vrcp.f32 %v649_v63 }
 0x9fe   :  { %v660_v42 = vpop.permute.xlu0 %659 }
 0x9ff   :  { %846 = vmatpush3.bf16.msra.mxu1 %v660_v42 }
 0xa01   :  { %v908_v43 = vpop.eup %907 }
 0xa02   :  { %v379_v44 = vpop.permute.xlu0 %378  ;;  %v654_v46 = vsel %vm650_vm10, %v908_v43, 0.0 }
 0xa03   :  { %v422_v45 = vadd.f32 %v1096_v38, %v379_v44  ;;  %v656_v49 = vmul.f32 %v904_v36, %v654_v46 }
 0xa05   :  { %v910_v47 = vpop.eup %909  ;;  %430 = vrot.lane.b32.xlu0 %v422_v45, %s951_s23 }
 0xa06   :  { %v655_v23 = vsel %vm651_vm11, %v910_v47, 0.0  ;;  %v381_v48 = vpop.permute.xlu0 %380 }
 0xa07   :  { %v657_v22 = vmul.f32 %v906_v39, %v655_v23  ;;  %v425_v50 = vadd.f32 %v1098_v40, %v381_v48 }
 0xa09   :  { %432 = vrot.lane.b32.xlu1 %v425_v50, %s951_s23  ;;  %572 = vrot.lane.b32.xlu0 %v564_v33, %s947_s19  ;;  %v658_v51 = vpack.c.bf16 %v657_v22, %v656_v49 }
 0xa0a   :  { %v523_v52 = vpop.permute.xlu0 %522 }
 0xa0b   :  { %v567_v53 = vadd.f32 %v1118_v14, %v523_v52  ;;  %848 = vmatmul.mubr.msk.bf16.vlgmr.msra.gmra.mrb[28].mxu1 %vm212_vm3, %v658_v51 }
 0xa0d   :  { %574 = vrot.lane.b32.xlu1 %v567_v53, %s947_s19 }
 0xa0e   :  { %v663_v38 = vpop.permute.xlu0 %662 }
 0xa12   :  { %v665_v54 = vpop.permute.xlu0 %664 }
 0xa16   :  { %v246_v55 = vpop.permute.xlu0 %245 }
 0xa17   :  { %v289_v56 = vadd.f32 %v1074_v61, %v246_v55 }
 0xa19   :  { %295 = vst.msk [vmem:[#allocation2] sm:$0xff] %vm164_vm2, %v289_v56 }
 0xa77   :  { %v431_v40 = vpop.permute.xlu0 %430 }
 0xa78   :  { %437 = vst.msk [vmem:[#allocation2] sm:$0xff] %vm436_vm12, %v431_v40 }
 0xa7b   :  { %v573_v57 = vpop.permute.xlu0 %572  ;;  %v433_v58 = vpop.permute.xlu1 %432 }
 0xa7c   :  { %579 = vst.msk [vmem:[#allocation2] sm:$0xff] %vm578_vm13, %v573_v57 }
 0xa7d   :  { %438 = vst.msk [vmem:[#allocation2 + $0x8] sm:$0xff] %vm436_vm12, %v433_v58 }
 0xa7f   :  { %v575_v59 = vpop.permute.xlu1 %574 }
 0xa80   :  { %580 = vst.msk [vmem:[#allocation2 + $0x8] sm:$0xff] %vm578_vm13, %v575_v59 }
 0xade   :  { %v705_v60 = vpop.f32.mrb[28].mxu1 }
 0xadf   :  { %v706_v62 = vadd.f32 %v705_v60, %v663_v38  ;;  %v849_v0 = vpop.f32.mrb[29].mxu1 }
 0xae0   :  { %v708_v2 = vpop.f32.mrb[30].mxu1 }
 0xae1   :  { %v709_v3 = vadd.f32 %v708_v2, %v665_v54  ;;  %714 = vrot.lane.b32.xlu0 %v706_v62, %s950_s22  ;;  %v850_v61 = vpop.f32.mrb[31].mxu1 }
 0xae3   :  { %716 = vrot.lane.b32.xlu1 %v709_v3, %s950_s22 }
 0xb53   :  { %v715_v4 = vpop.permute.xlu0 %714 }
 0xb54   :  { %721 = vst.msk [vmem:[#allocation2] sm:$0xff] %vm720_vm14, %v715_v4 }
 0xb55   :  { %v717_v5 = vpop.permute.xlu1 %716 }
 0xb56   :  { %722 = vst.msk [vmem:[#allocation2 + $0x8] sm:$0xff] %vm720_vm14, %v717_v5 }
 0xb57   :  { %922 = shalt.err (!%p919_p4)
}
 0xb58   :  { %s923_s29 = scalar_lea.hbm %s1174_s4, 256 }
 0xb59   :  { %p924_p5 = scmp.ne.s32.totalorder %s1174_s4, %s923_s29  ;;  %p927_p6 = scmp.lt.u32.totalorder %s923_s29, %s1174_s4 }
 0xb5b   :  { %p929_p7 = pnand %p927_p6, %p924_p5 }
 0xb5d   :  { %932 = shalt.err (!%p929_p7)
}
 0xb5e   :  { %s953_s8 = smov 128  }
 0xb5f   :  { %734 = dma.vmem_to_hbm [thread:$0]  %s729_s25, 256, %s1174_s4, [#allocation3], %s953_s8, %s953_s8, %s951_s23  }
 0xb60   :  { %933 = dma.done.wait [#allocation3], 256  }
 0xb61   :  { %934 = vsyncadd [#allocation3], 4294967040 }
 0xb62   :  { %738 = vsyncpa [#allocation3], 1 }

</bundles_post_ra>
